<compile_context>
chip_gen: v7x
topology: tpu7x:2x2x1
jax: 0.10.0
libtpu: 0.0.40
codegen_flags: <defaults>
</compile_context>

<pallas_src>
import math

import jax
import jax.numpy as jnp
from jax.experimental import pallas as pl
from jax.experimental.pallas import tpu as pltpu

# ---- small, module-consistent sizes -------------------------------------
B, S, D = 2, 8, 32          # batch, seq, d_model ("size" of the SublayerConnection)
H = 4                       # attention heads
DK = D // H                 # per-head dim
DFF = 64                    # feed-forward hidden dim
EPS = 1e-6                  # LayerNorm eps (matches module default)


def _layer_norm(v, a, b, feat):
    # PyTorch: a_2 * (x - mean) / (std + eps) + b_2, std is UNBIASED (N-1)
    mean = jnp.mean(v, axis=-1, keepdims=True)
    var = jnp.sum((v - mean) ** 2, axis=-1, keepdims=True) * jnp.float32(1.0 / (feat - 1))
    inv = pl.reciprocal(jnp.sqrt(var) + EPS)   # exact reciprocal, still an EUP op
    return a * ((v - mean) * inv) + b


def encoder_layer_kernel(x_ref, vecs_ref, wqkv_ref, bqkv_ref, wo_ref, w1_ref, w2_ref, o_ref):
    f32 = jnp.float32
    x = x_ref[...].astype(f32).reshape(B * S, D)          # (16, 32), merge batch into rows

    # packed small vectors: rows [a1, b1, a2, b2, bo, bf2, bf1, pad] of an (8, DFF) slab
    a1 = vecs_ref[0:1, :D]
    b1 = vecs_ref[1:2, :D]
    a2 = vecs_ref[2:3, :D]
    b2 = vecs_ref[3:4, :D]
    bo = vecs_ref[4:5, :D]
    bf2 = vecs_ref[5:6, :D]
    bf1 = vecs_ref[6:7, :DFF]

    wqkv = wqkv_ref[...]                                   # (H, D, 3*DK), q cols pre-scaled
    bqkv = bqkv_ref[...]                                   # (H, 1, 3*DK)
    wo_h = wo_ref[...]                                     # (H, DK, D)

    # ---- sublayer 0: pre-norm + multi-head self attention + residual ----
    y = _layer_norm(x, a1, b1, D)                          # (16, 32)

    # TODO(synk): dropout is identity here (eval mode); training-mode RNG mask not implemented.
    attn_rows = []
    for b in range(B):                                     # static unroll over batch (2)
        yb = y[b * S:(b + 1) * S]                          # (S, D)   sublane slice
        ybh = jnp.broadcast_to(yb, (H, S, D))              # replicate along head (major) axis
        # fused Q/K/V projection, heads batched: one dot_general -> (H, S, 3*DK)
        qkv = jnp.einsum("hsd,hdk->hsk", ybh, wqkv, preferred_element_type=f32) + bqkv
        q = qkv[:, :, :DK]                                 # already scaled by 1/sqrt(DK)
        k = qkv[:, :, DK:2 * DK]
        v = qkv[:, :, 2 * DK:]

        # scores without materializing k^T; H is a batch dim
        sc = jnp.einsum("hqd,hkd->hqk", q, k, preferred_element_type=f32)     # (H, S, S)
        m = jnp.max(sc, axis=-1, keepdims=True)
        p = jnp.exp(sc - m)
        attn = p * pl.reciprocal(jnp.sum(p, axis=-1, keepdims=True), approx=True)

        ctx = jnp.einsum("hqk,hkd->hqd", attn, v, preferred_element_type=f32)  # (H, S, DK)
        # head-wise output projection then sum over heads (replaces lane concat + big matmul)
        proj = jnp.einsum("hsd,hdm->hsm", ctx, wo_h, preferred_element_type=f32)  # (H, S, D)
        attn_rows.append(jnp.sum(proj, axis=0))                                   # (S, D)

    attn_out = jnp.concatenate(attn_rows, axis=0) + bo     # (16, 32), sublane concat only
    x2 = x + attn_out                                      # residual (dropout = identity)

    # ---- sublayer 1: pre-norm + position-wise feed forward + residual ---
    y2 = _layer_norm(x2, a2, b2, D)
    h1 = jnp.maximum(jnp.dot(y2, w1_ref[...], preferred_element_type=f32) + bf1, 0.0)
    ff = jnp.dot(h1, w2_ref[...], preferred_element_type=f32) + bf2

    o_ref[...] = (x2 + ff).reshape(B, S, D).astype(o_ref.dtype)


# ---------------- wrapper: param packing + pallas_call ----------------------
def _full_spec(shape):
    # whole (small) tensor resident in VMEM; single grid step
    return pl.BlockSpec(shape, lambda i: (0,) * len(shape))


def pack_params(params):
    (a1, b1, a2, b2, wq, bq, wk, bk, wv, bv, wo, bo, w1, bf1, w2, bf2) = params
    scale = jnp.float32(1.0 / math.sqrt(DK))

    def w_heads(w):   # (D, H*DK) -> (H, D, DK)
        return w.reshape(D, H, DK).transpose(1, 0, 2)

    def b_heads(bias):  # (1, H*DK) -> (H, 1, DK)
        return bias.reshape(1, H, DK).transpose(1, 0, 2)

    # fused, head-stacked QKV with 1/sqrt(DK) folded into the Q columns
    wqkv_h = jnp.concatenate([w_heads(wq * scale), w_heads(wk), w_heads(wv)], axis=-1)  # (H,D,3DK)
    bqkv_h = jnp.concatenate([b_heads(bq * scale), b_heads(bk), b_heads(bv)], axis=-1)  # (H,1,3DK)
    wo_h = wo.reshape(H, DK, D)                                                         # (H,DK,D)

    def row(v):
        v = v.reshape(1, -1)
        return jnp.pad(v, ((0, 0), (0, DFF - v.shape[1])))

    vecs = jnp.concatenate(
        [row(a1), row(b1), row(a2), row(b2), row(bo), row(bf2), row(bf1),
         jnp.zeros((1, DFF), jnp.float32)], axis=0)                                     # (8, 64)
    return vecs, wqkv_h, bqkv_h, wo_h, w1, w2


def encoder_layer(x, params):
    vecs, wqkv_h, bqkv_h, wo_h, w1, w2 = pack_params(params)
    ins = (x, vecs, wqkv_h, bqkv_h, wo_h, w1, w2)
    return pl.pallas_call(
        encoder_layer_kernel,
        out_shape=jax.ShapeDtypeStruct((B, S, D), jnp.float32),
        grid=(1,),                      # collapsed grid: one invocation, B handled in-kernel
        in_specs=[_full_spec(a.shape) for a in ins],
        out_specs=_full_spec((B, S, D)),
        compiler_params=pltpu.CompilerParams(dimension_semantics=("arbitrary",)),
    )(*ins)


# ---------------- pure-JAX reference (same math, unpacked params) -----------
def reference(x, params):
    (a1, b1, a2, b2, wq, bq, wk, bk, wv, bv, wo, bo, w1, bf1, w2, bf2) = params

    def ln(v, a, b):
        mean = jnp.mean(v, axis=-1, keepdims=True)
        var = jnp.sum((v - mean) ** 2, axis=-1, keepdims=True) / (D - 1)
        return a * (v - mean) / (jnp.sqrt(var) + EPS) + b

    y = ln(x, a1, b1)
    q = y @ wq + bq
    k = y @ wk + bk
    v = y @ wv + bv
    qh = q.reshape(B, S, H, DK).transpose(0, 2, 1, 3)
    kh = k.reshape(B, S, H, DK).transpose(0, 2, 1, 3)
    vh = v.reshape(B, S, H, DK).transpose(0, 2, 1, 3)
    sc = jnp.einsum("bhqd,bhkd->bhqk", qh, kh) / jnp.sqrt(jnp.float32(DK))
    attn = jax.nn.softmax(sc, axis=-1)
    ctx = jnp.einsum("bhqk,bhkd->bhqd", attn, vh).transpose(0, 2, 1, 3).reshape(B, S, D)
    x2 = x + (ctx @ wo + bo)
    y2 = ln(x2, a2, b2)
    ff = jnp.maximum(y2 @ w1 + bf1, 0.0) @ w2 + bf2
    return x2 + ff


if __name__ == "__main__":
    key = jax.random.PRNGKey(0)
    keys = jax.random.split(key, 8)

    x = jax.random.normal(keys[0], (B, S, D), dtype=jnp.float32)

    # LayerNorm params match module init (ones / zeros); linear weights random.
    a1 = jnp.ones((1, D), jnp.float32)
    b1 = jnp.zeros((1, D), jnp.float32)
    a2 = jnp.ones((1, D), jnp.float32)
    b2 = jnp.zeros((1, D), jnp.float32)

    wq = 0.1 * jax.random.normal(keys[1], (D, D), jnp.float32)
    wk = 0.1 * jax.random.normal(keys[2], (D, D), jnp.float32)
    wv = 0.1 * jax.random.normal(keys[3], (D, D), jnp.float32)
    wo = 0.1 * jax.random.normal(keys[4], (D, D), jnp.float32)
    bq = jnp.zeros((1, D), jnp.float32)
    bk = jnp.zeros((1, D), jnp.float32)
    bv = jnp.zeros((1, D), jnp.float32)
    bo = jnp.zeros((1, D), jnp.float32)

    w1 = 0.1 * jax.random.normal(keys[5], (D, DFF), jnp.float32)
    bf1 = 0.01 * jax.random.normal(keys[6], (1, DFF), jnp.float32)
    w2 = 0.1 * jax.random.normal(keys[7], (DFF, D), jnp.float32)
    bf2 = jnp.zeros((1, D), jnp.float32)

    params = (a1, b1, a2, b2, wq, bq, wk, bk, wv, bv, wo, bo, w1, bf1, w2, bf2)

    out = jax.block_until_ready(encoder_layer(x, params))
    ref = jax.block_until_ready(reference(x, params))

    assert out.shape == (B, S, D)
    # tolerance relaxed (1e-4 -> 2e-3) because softmax denom uses the approximate
    # EUP reciprocal (pl.reciprocal(approx=True)), as recommended in the review.
    assert jnp.allclose(out, ref, atol=2e-3, rtol=2e-3), (
        f"max abs err = {jnp.max(jnp.abs(out - ref))}"
    )
    print("KERNEL_OK")
</pallas_src>

<mosaic_0001>
module attributes {stable_mosaic.version = 11 : i64} {
  func.func @encoder_layer_kernel(%arg0: i32, %arg1: memref<2x8x32xf32, #tpu.memory_space<vmem>>, %arg2: memref<8x64xf32, #tpu.memory_space<vmem>>, %arg3: memref<4x32x24xf32, #tpu.memory_space<vmem>>, %arg4: memref<4x1x24xf32, #tpu.memory_space<vmem>>, %arg5: memref<4x8x32xf32, #tpu.memory_space<vmem>>, %arg6: memref<32x64xf32, #tpu.memory_space<vmem>>, %arg7: memref<64x32xf32, #tpu.memory_space<vmem>>, %arg8: memref<2x8x32xf32, #tpu.memory_space<vmem>>) attributes {dimension_semantics = [#tpu.dimension_semantics<arbitrary>], iteration_bounds = array<i64: 1>, scalar_prefetch = 0 : i64, scratch_operands = 0 : i64, tpu.core_type = #tpu.core_type<tc>, window_params = [{pipeline_mode = #tpu.pipeline_mode<synchronous>, transform_indices = @transform_0, window_bounds = array<i64: 2, 8, 32>}, {pipeline_mode = #tpu.pipeline_mode<synchronous>, transform_indices = @transform_1, window_bounds = array<i64: 8, 64>}, {pipeline_mode = #tpu.pipeline_mode<synchronous>, transform_indices = @transform_2, window_bounds = array<i64: 4, 32, 24>}, {pipeline_mode = #tpu.pipeline_mode<synchronous>, transform_indices = @transform_3, window_bounds = array<i64: 4, 1, 24>}, {pipeline_mode = #tpu.pipeline_mode<synchronous>, transform_indices = @transform_4, window_bounds = array<i64: 4, 8, 32>}, {pipeline_mode = #tpu.pipeline_mode<synchronous>, transform_indices = @transform_5, window_bounds = array<i64: 32, 64>}, {pipeline_mode = #tpu.pipeline_mode<synchronous>, transform_indices = @transform_6, window_bounds = array<i64: 64, 32>}, {pipeline_mode = #tpu.pipeline_mode<synchronous>, transform_indices = @transform_7, window_bounds = array<i64: 2, 8, 32>}]} {
    %c0 = arith.constant 0 : index
    %c0_0 = arith.constant 0 : index
    %c0_1 = arith.constant 0 : index
    %0 = vector.load %arg1[%c0, %c0_0, %c0_1] : memref<2x8x32xf32, #tpu.memory_space<vmem>>, vector<2x8x32xf32>
    %1 = vector.shape_cast %0 : vector<2x8x32xf32> to vector<16x32xf32>
    %c0_2 = arith.constant 0 : index
    %c0_3 = arith.constant 0 : index
    %2 = vector.load %arg2[%c0_2, %c0_3] : memref<8x64xf32, #tpu.memory_space<vmem>>, vector<1x32xf32>
    %c1 = arith.constant 1 : index
    %c0_4 = arith.constant 0 : index
    %3 = vector.load %arg2[%c1, %c0_4] : memref<8x64xf32, #tpu.memory_space<vmem>>, vector<1x32xf32>
    %c2 = arith.constant 2 : index
    %c0_5 = arith.constant 0 : index
    %4 = vector.load %arg2[%c2, %c0_5] : memref<8x64xf32, #tpu.memory_space<vmem>>, vector<1x32xf32>
    %c3 = arith.constant 3 : index
    %c0_6 = arith.constant 0 : index
    %5 = vector.load %arg2[%c3, %c0_6] : memref<8x64xf32, #tpu.memory_space<vmem>>, vector<1x32xf32>
    %c4 = arith.constant 4 : index
    %c0_7 = arith.constant 0 : index
    %6 = vector.load %arg2[%c4, %c0_7] : memref<8x64xf32, #tpu.memory_space<vmem>>, vector<1x32xf32>
    %c5 = arith.constant 5 : index
    %c0_8 = arith.constant 0 : index
    %7 = vector.load %arg2[%c5, %c0_8] : memref<8x64xf32, #tpu.memory_space<vmem>>, vector<1x32xf32>
    %c6 = arith.constant 6 : index
    %c0_9 = arith.constant 0 : index
    %8 = vector.load %arg2[%c6, %c0_9] : memref<8x64xf32, #tpu.memory_space<vmem>>, vector<1x64xf32>
    %c0_10 = arith.constant 0 : index
    %c0_11 = arith.constant 0 : index
    %c0_12 = arith.constant 0 : index
    %9 = vector.load %arg3[%c0_10, %c0_11, %c0_12] : memref<4x32x24xf32, #tpu.memory_space<vmem>>, vector<4x32x24xf32>
    %c0_13 = arith.constant 0 : index
    %c0_14 = arith.constant 0 : index
    %c0_15 = arith.constant 0 : index
    %10 = vector.load %arg4[%c0_13, %c0_14, %c0_15] : memref<4x1x24xf32, #tpu.memory_space<vmem>>, vector<4x1x24xf32>
    %c0_16 = arith.constant 0 : index
    %c0_17 = arith.constant 0 : index
    %c0_18 = arith.constant 0 : index
    %11 = vector.load %arg5[%c0_16, %c0_17, %c0_18] : memref<4x8x32xf32, #tpu.memory_space<vmem>>, vector<4x8x32xf32>
    %cst = arith.constant dense<0.000000e+00> : vector<16xf32>
    %12 = vector.multi_reduction <add>, %1, %cst [1] : vector<16x32xf32> to vector<16xf32>
    %13 = vector.shape_cast %12 : vector<16xf32> to vector<16x1xf32>
    %cst_19 = arith.constant 3.200000e+01 : f32
    %14 = vector.broadcast %cst_19 : f32 to vector<16x1xf32>
    %15 = arith.divf %13, %14 : vector<16x1xf32>
    %16 = vector.broadcast %15 : vector<16x1xf32> to vector<16x32xf32>
    %17 = arith.subf %1, %16 : vector<16x32xf32>
    %18 = arith.mulf %17, %17 : vector<16x32xf32>
    %cst_20 = arith.constant dense<0.000000e+00> : vector<16xf32>
    %19 = vector.multi_reduction <add>, %18, %cst_20 [1] : vector<16x32xf32> to vector<16xf32>
    %20 = vector.shape_cast %19 : vector<16xf32> to vector<16x1xf32>
    %cst_21 = arith.constant 0.0322580636 : f32
    %21 = vector.broadcast %cst_21 : f32 to vector<16x1xf32>
    %22 = arith.mulf %20, %21 : vector<16x1xf32>
    %23 = math.sqrt %22 : vector<16x1xf32>
    %cst_22 = arith.constant 9.99999997E-7 : f32
    %24 = vector.broadcast %cst_22 : f32 to vector<16x1xf32>
    %25 = arith.addf %23, %24 : vector<16x1xf32>
    %26 = tpu.reciprocal %25 : vector<16x1xf32> -> vector<16x1xf32>
    %27 = vector.broadcast %15 : vector<16x1xf32> to vector<16x32xf32>
    %28 = arith.subf %1, %27 : vector<16x32xf32>
    %29 = vector.broadcast %26 : vector<16x1xf32> to vector<16x32xf32>
    %30 = arith.mulf %28, %29 : vector<16x32xf32>
    %31 = vector.broadcast %2 : vector<1x32xf32> to vector<16x32xf32>
    %32 = arith.mulf %31, %30 : vector<16x32xf32>
    %33 = vector.broadcast %3 : vector<1x32xf32> to vector<16x32xf32>
    %34 = arith.addf %32, %33 : vector<16x32xf32>
    %35 = vector.extract_strided_slice %34 {offsets = [0, 0], sizes = [8, 32], strides = [1, 1]} : vector<16x32xf32> to vector<8x32xf32>
    %36 = vector.shape_cast %35 : vector<8x32xf32> to vector<1x8x32xf32>
    %37 = vector.broadcast %36 : vector<1x8x32xf32> to vector<4x8x32xf32>
    "tpu.trace_start"() <{level = 10 : i32, message = "hsd,hdk->hsk"}> : () -> ()
    %cst_23 = arith.constant dense<0.000000e+00> : vector<4x8x24xf32>
    %38 = tpu.matmul %37, %9, %cst_23 {dimension_numbers = #tpu.dot_dimension_numbers<[2], [1], [1], [2], [0, 0, 0, 1, 1, 2], [0], [0]>} : vector<4x8x32xf32>, vector<4x32x24xf32>, vector<4x8x24xf32> -> vector<4x8x24xf32>
    "tpu.trace_stop"() : () -> ()
    %39 = vector.broadcast %10 : vector<4x1x24xf32> to vector<4x8x24xf32>
    %40 = arith.addf %38, %39 : vector<4x8x24xf32>
    %41 = vector.extract_strided_slice %40 {offsets = [0, 0, 0], sizes = [4, 8, 8], strides = [1, 1, 1]} : vector<4x8x24xf32> to vector<4x8x8xf32>
    %42 = vector.extract_strided_slice %40 {offsets = [0, 0, 8], sizes = [4, 8, 8], strides = [1, 1, 1]} : vector<4x8x24xf32> to vector<4x8x8xf32>
    %43 = vector.extract_strided_slice %40 {offsets = [0, 0, 16], sizes = [4, 8, 8], strides = [1, 1, 1]} : vector<4x8x24xf32> to vector<4x8x8xf32>
    "tpu.trace_start"() <{level = 10 : i32, message = "hqd,hkd->hqk"}> : () -> ()
    %cst_24 = arith.constant dense<0.000000e+00> : vector<4x8x8xf32>
    %44 = tpu.matmul %41, %42, %cst_24 {dimension_numbers = #tpu.dot_dimension_numbers<[2], [2], [1], [1], [0, 0, 0, 1, 1, 1], [0], [0]>} : vector<4x8x8xf32>, vector<4x8x8xf32>, vector<4x8x8xf32> -> vector<4x8x8xf32>
    "tpu.trace_stop"() : () -> ()
    %cst_25 = arith.constant dense<0xFF800000> : vector<4x8xf32>
    %45 = vector.multi_reduction <maximumf>, %44, %cst_25 [2] : vector<4x8x8xf32> to vector<4x8xf32>
    %46 = vector.shape_cast %45 : vector<4x8xf32> to vector<4x8x1xf32>
    %47 = vector.broadcast %46 : vector<4x8x1xf32> to vector<4x8x8xf32>
    %48 = arith.subf %44, %47 : vector<4x8x8xf32>
    %49 = math.exp %48 : vector<4x8x8xf32>
    %cst_26 = arith.constant dense<0.000000e+00> : vector<4x8xf32>
    %50 = vector.multi_reduction <add>, %49, %cst_26 [2] : vector<4x8x8xf32> to vector<4x8xf32>
    %51 = vector.shape_cast %50 : vector<4x8xf32> to vector<4x8x1xf32>
    %52 = tpu.reciprocal %51 {approx = true} : vector<4x8x1xf32> -> vector<4x8x1xf32>
    %53 = vector.broadcast %52 : vector<4x8x1xf32> to vector<4x8x8xf32>
    %54 = arith.mulf %49, %53 : vector<4x8x8xf32>
    "tpu.trace_start"() <{level = 10 : i32, message = "hqk,hkd->hqd"}> : () -> ()
    %cst_27 = arith.constant dense<0.000000e+00> : vector<4x8x8xf32>
    %55 = tpu.matmul %54, %43, %cst_27 {dimension_numbers = #tpu.dot_dimension_numbers<[2], [1], [1], [2], [0, 0, 0, 1, 1, 2], [0], [0]>} : vector<4x8x8xf32>, vector<4x8x8xf32>, vector<4x8x8xf32> -> vector<4x8x8xf32>
    "tpu.trace_stop"() : () -> ()
    "tpu.trace_start"() <{level = 10 : i32, message = "hsd,hdm->hsm"}> : () -> ()
    %cst_28 = arith.constant dense<0.000000e+00> : vector<4x8x32xf32>
    %56 = tpu.matmul %55, %11, %cst_28 {dimension_numbers = #tpu.dot_dimension_numbers<[2], [1], [1], [2], [0, 0, 0, 1, 1, 2], [0], [0]>} : vector<4x8x8xf32>, vector<4x8x32xf32>, vector<4x8x32xf32> -> vector<4x8x32xf32>
    "tpu.trace_stop"() : () -> ()
    %cst_29 = arith.constant dense<0.000000e+00> : vector<8x32xf32>
    %57 = vector.multi_reduction <add>, %56, %cst_29 [0] : vector<4x8x32xf32> to vector<8x32xf32>
    %58 = vector.extract_strided_slice %34 {offsets = [8, 0], sizes = [8, 32], strides = [1, 1]} : vector<16x32xf32> to vector<8x32xf32>
    %59 = vector.shape_cast %58 : vector<8x32xf32> to vector<1x8x32xf32>
    %60 = vector.broadcast %59 : vector<1x8x32xf32> to vector<4x8x32xf32>
    "tpu.trace_start"() <{level = 10 : i32, message = "hsd,hdk->hsk"}> : () -> ()
    %cst_30 = arith.constant dense<0.000000e+00> : vector<4x8x24xf32>
    %61 = tpu.matmul %60, %9, %cst_30 {dimension_numbers = #tpu.dot_dimension_numbers<[2], [1], [1], [2], [0, 0, 0, 1, 1, 2], [0], [0]>} : vector<4x8x32xf32>, vector<4x32x24xf32>, vector<4x8x24xf32> -> vector<4x8x24xf32>
    "tpu.trace_stop"() : () -> ()
    %62 = vector.broadcast %10 : vector<4x1x24xf32> to vector<4x8x24xf32>
    %63 = arith.addf %61, %62 : vector<4x8x24xf32>
    %64 = vector.extract_strided_slice %63 {offsets = [0, 0, 0], sizes = [4, 8, 8], strides = [1, 1, 1]} : vector<4x8x24xf32> to vector<4x8x8xf32>
    %65 = vector.extract_strided_slice %63 {offsets = [0, 0, 8], sizes = [4, 8, 8], strides = [1, 1, 1]} : vector<4x8x24xf32> to vector<4x8x8xf32>
    %66 = vector.extract_strided_slice %63 {offsets = [0, 0, 16], sizes = [4, 8, 8], strides = [1, 1, 1]} : vector<4x8x24xf32> to vector<4x8x8xf32>
    "tpu.trace_start"() <{level = 10 : i32, message = "hqd,hkd->hqk"}> : () -> ()
    %cst_31 = arith.constant dense<0.000000e+00> : vector<4x8x8xf32>
    %67 = tpu.matmul %64, %65, %cst_31 {dimension_numbers = #tpu.dot_dimension_numbers<[2], [2], [1], [1], [0, 0, 0, 1, 1, 1], [0], [0]>} : vector<4x8x8xf32>, vector<4x8x8xf32>, vector<4x8x8xf32> -> vector<4x8x8xf32>
    "tpu.trace_stop"() : () -> ()
    %cst_32 = arith.constant dense<0xFF800000> : vector<4x8xf32>
    %68 = vector.multi_reduction <maximumf>, %67, %cst_32 [2] : vector<4x8x8xf32> to vector<4x8xf32>
    %69 = vector.shape_cast %68 : vector<4x8xf32> to vector<4x8x1xf32>
    %70 = vector.broadcast %69 : vector<4x8x1xf32> to vector<4x8x8xf32>
    %71 = arith.subf %67, %70 : vector<4x8x8xf32>
    %72 = math.exp %71 : vector<4x8x8xf32>
    %cst_33 = arith.constant dense<0.000000e+00> : vector<4x8xf32>
    %73 = vector.multi_reduction <add>, %72, %cst_33 [2] : vector<4x8x8xf32> to vector<4x8xf32>
    %74 = vector.shape_cast %73 : vector<4x8xf32> to vector<4x8x1xf32>
    %75 = tpu.reciprocal %74 {approx = true} : vector<4x8x1xf32> -> vector<4x8x1xf32>
    %76 = vector.broadcast %75 : vector<4x8x1xf32> to vector<4x8x8xf32>
    %77 = arith.mulf %72, %76 : vector<4x8x8xf32>
    "tpu.trace_start"() <{level = 10 : i32, message = "hqk,hkd->hqd"}> : () -> ()
    %cst_34 = arith.constant dense<0.000000e+00> : vector<4x8x8xf32>
    %78 = tpu.matmul %77, %66, %cst_34 {dimension_numbers = #tpu.dot_dimension_numbers<[2], [1], [1], [2], [0, 0, 0, 1, 1, 2], [0], [0]>} : vector<4x8x8xf32>, vector<4x8x8xf32>, vector<4x8x8xf32> -> vector<4x8x8xf32>
    "tpu.trace_stop"() : () -> ()
    "tpu.trace_start"() <{level = 10 : i32, message = "hsd,hdm->hsm"}> : () -> ()
    %cst_35 = arith.constant dense<0.000000e+00> : vector<4x8x32xf32>
    %79 = tpu.matmul %78, %11, %cst_35 {dimension_numbers = #tpu.dot_dimension_numbers<[2], [1], [1], [2], [0, 0, 0, 1, 1, 2], [0], [0]>} : vector<4x8x8xf32>, vector<4x8x32xf32>, vector<4x8x32xf32> -> vector<4x8x32xf32>
    "tpu.trace_stop"() : () -> ()
    %cst_36 = arith.constant dense<0.000000e+00> : vector<8x32xf32>
    %80 = vector.multi_reduction <add>, %79, %cst_36 [0] : vector<4x8x32xf32> to vector<8x32xf32>
    %81 = tpu.concatenate %57, %80 in 0 : vector<8x32xf32>, vector<8x32xf32> -> vector<16x32xf32>
    %82 = vector.broadcast %6 : vector<1x32xf32> to vector<16x32xf32>
    %83 = arith.addf %81, %82 : vector<16x32xf32>
    %84 = arith.addf %1, %83 : vector<16x32xf32>
    %cst_37 = arith.constant dense<0.000000e+00> : vector<16xf32>
    %85 = vector.multi_reduction <add>, %84, %cst_37 [1] : vector<16x32xf32> to vector<16xf32>
    %86 = vector.shape_cast %85 : vector<16xf32> to vector<16x1xf32>
    %cst_38 = arith.constant 3.200000e+01 : f32
    %87 = vector.broadcast %cst_38 : f32 to vector<16x1xf32>
    %88 = arith.divf %86, %87 : vector<16x1xf32>
    %89 = vector.broadcast %88 : vector<16x1xf32> to vector<16x32xf32>
    %90 = arith.subf %84, %89 : vector<16x32xf32>
    %91 = arith.mulf %90, %90 : vector<16x32xf32>
    %cst_39 = arith.constant dense<0.000000e+00> : vector<16xf32>
    %92 = vector.multi_reduction <add>, %91, %cst_39 [1] : vector<16x32xf32> to vector<16xf32>
    %93 = vector.shape_cast %92 : vector<16xf32> to vector<16x1xf32>
    %cst_40 = arith.constant 0.0322580636 : f32
    %94 = vector.broadcast %cst_40 : f32 to vector<16x1xf32>
    %95 = arith.mulf %93, %94 : vector<16x1xf32>
    %96 = math.sqrt %95 : vector<16x1xf32>
    %cst_41 = arith.constant 9.99999997E-7 : f32
    %97 = vector.broadcast %cst_41 : f32 to vector<16x1xf32>
    %98 = arith.addf %96, %97 : vector<16x1xf32>
    %99 = tpu.reciprocal %98 : vector<16x1xf32> -> vector<16x1xf32>
    %100 = vector.broadcast %88 : vector<16x1xf32> to vector<16x32xf32>
    %101 = arith.subf %84, %100 : vector<16x32xf32>
    %102 = vector.broadcast %99 : vector<16x1xf32> to vector<16x32xf32>
    %103 = arith.mulf %101, %102 : vector<16x32xf32>
    %104 = vector.broadcast %4 : vector<1x32xf32> to vector<16x32xf32>
    %105 = arith.mulf %104, %103 : vector<16x32xf32>
    %106 = vector.broadcast %5 : vector<1x32xf32> to vector<16x32xf32>
    %107 = arith.addf %105, %106 : vector<16x32xf32>
    %c0_42 = arith.constant 0 : index
    %c0_43 = arith.constant 0 : index
    %108 = vector.load %arg6[%c0_42, %c0_43] : memref<32x64xf32, #tpu.memory_space<vmem>>, vector<32x64xf32>
    %cst_44 = arith.constant dense<0.000000e+00> : vector<16x64xf32>
    %109 = tpu.matmul %107, %108, %cst_44 {dimension_numbers = #tpu.dot_dimension_numbers<[1], [0], [0], [1], [0, 0, 1, 1], [], []>} : vector<16x32xf32>, vector<32x64xf32>, vector<16x64xf32> -> vector<16x64xf32>
    %110 = vector.broadcast %8 : vector<1x64xf32> to vector<16x64xf32>
    %111 = arith.addf %109, %110 : vector<16x64xf32>
    %cst_45 = arith.constant 0.000000e+00 : f32
    %112 = vector.broadcast %cst_45 : f32 to vector<16x64xf32>
    %113 = arith.maximumf %111, %112 : vector<16x64xf32>
    %c0_46 = arith.constant 0 : index
    %c0_47 = arith.constant 0 : index
    %114 = vector.load %arg7[%c0_46, %c0_47] : memref<64x32xf32, #tpu.memory_space<vmem>>, vector<64x32xf32>
    %cst_48 = arith.constant dense<0.000000e+00> : vector<16x32xf32>
    %115 = tpu.matmul %113, %114, %cst_48 {dimension_numbers = #tpu.dot_dimension_numbers<[1], [0], [0], [1], [0, 0, 1, 1], [], []>} : vector<16x64xf32>, vector<64x32xf32>, vector<16x32xf32> -> vector<16x32xf32>
    %116 = vector.broadcast %7 : vector<1x32xf32> to vector<16x32xf32>
    %117 = arith.addf %115, %116 : vector<16x32xf32>
    %118 = arith.addf %84, %117 : vector<16x32xf32>
    %119 = vector.shape_cast %118 : vector<16x32xf32> to vector<2x8x32xf32>
    %c0_49 = arith.constant 0 : index
    %c0_50 = arith.constant 0 : index
    %c0_51 = arith.constant 0 : index
    %120 = vector.load %arg8[%c0_49, %c0_50, %c0_51] : memref<2x8x32xf32, #tpu.memory_space<vmem>>, vector<2x8x32xf32>
    tpu.vector_store %arg8[%c0_49, %c0_50, %c0_51], %119 {strides = array<i32>} : memref<2x8x32xf32, #tpu.memory_space<vmem>>, vector<2x8x32xf32>,
    return
  }
  func.func @transform_0(%arg0: i32) -> (i32, i32, i32) {
    %c0_i32 = arith.constant 0 : i32
    %c0_i32_0 = arith.constant 0 : i32
    %c0_i32_1 = arith.constant 0 : i32
    %c0_i32_2 = arith.constant 0 : i32
    return %c0_i32, %c0_i32_0, %c0_i32_1 : i32, i32, i32
  }
  func.func @transform_1(%arg0: i32) -> (i32, i32) {
    %c0_i32 = arith.constant 0 : i32
    %c0_i32_0 = arith.constant 0 : i32
    %c0_i32_1 = arith.constant 0 : i32
    return %c0_i32, %c0_i32_0 : i32, i32
  }
  func.func @transform_2(%arg0: i32) -> (i32, i32, i32) {
    %c0_i32 = arith.constant 0 : i32
    %c0_i32_0 = arith.constant 0 : i32
    %c0_i32_1 = arith.constant 0 : i32
    %c0_i32_2 = arith.constant 0 : i32
    return %c0_i32, %c0_i32_0, %c0_i32_1 : i32, i32, i32
  }
  func.func @transform_3(%arg0: i32) -> (i32, i32, i32) {
    %c0_i32 = arith.constant 0 : i32
    %c0_i32_0 = arith.constant 0 : i32
    %c0_i32_1 = arith.constant 0 : i32
    %c0_i32_2 = arith.constant 0 : i32
    return %c0_i32, %c0_i32_0, %c0_i32_1 : i32, i32, i32
  }
  func.func @transform_4(%arg0: i32) -> (i32, i32, i32) {
    %c0_i32 = arith.constant 0 : i32
    %c0_i32_0 = arith.constant 0 : i32
    %c0_i32_1 = arith.constant 0 : i32
    %c0_i32_2 = arith.constant 0 : i32
    return %c0_i32, %c0_i32_0, %c0_i32_1 : i32, i32, i32
  }
  func.func @transform_5(%arg0: i32) -> (i32, i32) {
    %c0_i32 = arith.constant 0 : i32
    %c0_i32_0 = arith.constant 0 : i32
    %c0_i32_1 = arith.constant 0 : i32
    return %c0_i32, %c0_i32_0 : i32, i32
  }
  func.func @transform_6(%arg0: i32) -> (i32, i32) {
    %c0_i32 = arith.constant 0 : i32
    %c0_i32_0 = arith.constant 0 : i32
    %c0_i32_1 = arith.constant 0 : i32
    return %c0_i32, %c0_i32_0 : i32, i32
  }
  func.func @transform_7(%arg0: i32) -> (i32, i32, i32) {
    %c0_i32 = arith.constant 0 : i32
    %c0_i32_0 = arith.constant 0 : i32
    %c0_i32_1 = arith.constant 0 : i32
    %c0_i32_2 = arith.constant 0 : i32
    return %c0_i32, %c0_i32_0, %c0_i32_1 : i32, i32, i32
  }
}

</mosaic_0001>

<bundles_post_ra>
// kernel: tpu_custom_call.1
= control target key start
LH: loop header
LB: loop body
LE: loop exit
PB: predicated region body
PF: predicated region fallthrough
CT: control target
= control target key end

     0   :  { %vm60_vm0 = vcmask 261120   ;;  %s3939_s0 = inlined_call_operand.vmem [shape: f32[2,8,32], index: 0, kind: input, shape index: {}]   ;;  %s3940_s1 = inlined_call_operand.vmem [shape: f32[8,64], index: 1, kind: input, shape index: {}]   ;;  %s3941_s2 = inlined_call_operand.vmem [shape: f32[4,32,24], index: 2, kind: input, shape index: {}]   ;;  %s3942_s3 = inlined_call_operand.vmem [shape: f32[4,1,24], index: 3, kind: input, shape index: {}]   ;;  %s3943_s4 = inlined_call_operand.vmem [shape: f32[4,8,32], index: 4, kind: input, shape index: {}]   ;;  %s3944_s5 = inlined_call_operand.vmem [shape: f32[32,64], index: 5, kind: input, shape index: {}]   ;;  %s3945_s6 = inlined_call_operand.vmem [shape: f32[64,32], index: 6, kind: input, shape index: {}]   ;;  %s3946_s7 = inlined_call_operand.hbm [shape: f32[2,8,32], index: 7, kind: output, shape index: {}]  }
   0x1   :  { %v3480_v0 = vld [vmem:[%s3939_s0] sm:$0xff] }
   0x2   :  { %12 = vsyncpa [#allocation3], 0  ;;  %v61_v1 = vsel %vm60_vm0, %v3480_v0, 0.0  ;;  %v36_v7 = vld [vmem:[%s3941_s2] sm:$0xff]  ;;  %v37_v8 = vld [vmem:[%s3941_s2 + $0x8] sm:$0xff]  ;;  %v3429_v10 = vmov 0.0|0.0  }
   0x3   :  { %62 = vadd.xlane.f32.xlu0 %v61_v1  ;;  %v40_v9 = vld [vmem:[%s3941_s2 + $0x20] sm:$0xff]  ;;  %3277 = vmatprep.subr.bf16.mxu0 %v3429_v10  ;;  %v3497_v11 = vpack.c.bf16 %v37_v8, %v36_v7  ;;  %v41_v12 = vld [vmem:[%s3941_s2 + $0x28] sm:$0xff]  ;;  %v38_v13 = vld [vmem:[%s3941_s2 + $0x10] sm:$0xff]  ;;  %vm3430_vm1 = vmmov 0   ;;  %v3431_v18 = vmov 0.0   ;;  %s3432_s19 = smov 120  }
   0x4   :  { %3283 = vmatprep.subr.bf16.mxu1 %v3429_v10  ;;  %v39_v14 = vld [vmem:[%s3941_s2 + $0x18] sm:$0xff]  ;;  %v3508_v15 = vpack.c.bf16 %v41_v12, %v40_v9  ;;  %v42_v16 = vld [vmem:[%s3941_s2 + $0x30] sm:$0xff]  ;;  %3047 = vmatprep.mubr.msk.f32.mxu0 %vm3430_vm1, %v3431_v18  ;;  %v3535_v30 = vld [vmem:[%s3940_s1] ss:$0 sm:$0xff]  ;;  %vm424_vm4 = vcmask 64512   ;;  %vm2778_vm11 = vcmask 523264  }
   0x5   :  { %v43_v17 = vld [vmem:[%s3941_s2 + $0x38] sm:$0xff]  ;;  %3058 = vmatprep.mubr.msk.f32.mxu1 %vm3430_vm1, %v3431_v18  ;;  %3279 = vmatpush3.bf16.msra.mxu0 %v3497_v11  ;;  %v3521_v19 = vpack.c.bf16 %v39_v14, %v38_v13  ;;  %v44_v31 = vld [vmem:[%s3941_s2 + $0x40] sm:$0xff]  ;;  %v45_v33 = vld [vmem:[%s3941_s2 + $0x48] sm:$0xff] }
   0x6   :  { %3285 = vmatpush3.bf16.msra.mxu1 %v3508_v15  ;;  %3280 = vmatprep.subr.bf16.mxu0 %v3429_v10  ;;  %v3525_v20 = vpack.c.bf16 %v43_v17, %v42_v16  ;;  %v48_v34 = vld [vmem:[%s3941_s2 + $0x60] sm:$0xff]  ;;  %v49_v35 = vld [vmem:[%s3941_s2 + $0x68] sm:$0xff]  ;;  %v3555_v38 = vpack.c.bf16 %v45_v33, %v44_v31  ;;  %v46_v40 = vld [vmem:[%s3941_s2 + $0x50] sm:$0xff] }
   0x7   :  { %3286 = vmatprep.subr.bf16.mxu1 %v3429_v10  ;;  %v3552_v36 = vld [vmem:[%s3940_s1 + $0x1] ss:$0 sm:$0xff]  ;;  %v3557_v39 = vpack.c.bf16 %v49_v35, %v48_v34  ;;  %v47_v42 = vld [vmem:[%s3941_s2 + $0x58] sm:$0xff]  ;;  %v50_v43 = vld [vmem:[%s3941_s2 + $0x70] sm:$0xff] }
   0x8   :  { %v51_v44 = vld [vmem:[%s3941_s2 + $0x78] sm:$0xff]  ;;  %v3576_v45 = vpack.c.bf16 %v47_v42, %v46_v40  ;;  %v3599_v47 = vld [vmem:[%s3942_s3] ss:$0 sm:$0xff]  ;;  %v3605_v53 = vld [vmem:[%s3942_s3 + $0x1] ss:$0 sm:$0xff] }
   0x9   :  { %3282 = vmatpush3.bf16.msra.mxu0 %v3521_v19  ;;  %v3578_v46 = vpack.c.bf16 %v51_v44, %v50_v43  ;;  %v3612_v55 = vld [vmem:[%s3942_s3 + $0x3] ss:$0 sm:$0xff]  ;;  %v3617_v56 = vld [vmem:[%s3942_s3 + $0x2] ss:$0 sm:$0xff]  ;;  %s3433_s3 = smov 112  }
   0xa   :  { %3288 = vmatpush3.bf16.msra.mxu1 %v3525_v20  ;;  %3289 = vmatprep.subr.bf16.mxu0 %v3429_v10 }
   0xb   :  { %3295 = vmatprep.subr.bf16.mxu1 %v3429_v10 }
  0x90   :  { %v63_v2 = vpop.xlane.xlu0 %62 }
  0x91   :  { %v68_v3 = vmul.f32 0.03125, %v63_v2 }
  0x93   :  { %v70_v4 = vsub.f32 %v3480_v0, %v68_v3 }
  0x95   :  { %v72_v5 = vmul.f32 %v70_v4, %v70_v4 }
  0x97   :  { %v74_v6 = vsel %vm60_vm0, %v72_v5, 0.0 }
  0x98   :  { %75 = vadd.xlane.f32.xlu0 %v74_v6 }
 0x125   :  { %v76_v21 = vpop.xlane.xlu0 %75 }
 0x126   :  { %v80_v22 = vmul.f32 0.032258064, %v76_v21 }
 0x128   :  { %3357 = vrsqrt.f32 %v80_v22  ;;  %vm84_vm2 = vcmp.eq.f32.partialorder %v80_v22, inf  ;;  %v87_v25 = vand.u32 2147483648, %v80_v22  ;;  %vm86_vm3 = vcmp.eq.f32.partialorder %v80_v22, 0.0 }
 0x132   :  { %v3358_v23 = vpop.eup %3357 }
 0x133   :  { %v83_v24 = vmul.f32 %v3358_v23, %v80_v22 }
 0x135   :  { %v85_v26 = vsel %vm84_vm2, %v80_v22, %v83_v24 }
 0x136   :  { %v88_v27 = vsel %vm86_vm3, %v87_v25, %v85_v26 }
 0x137   :  { %v96_v28 = vadd.f32 1e-06, %v88_v27 }
 0x139   :  { %3359 = vrcp.f32 %v96_v28 }
 0x143   :  { %v3360_v29 = vpop.eup %3359 }
 0x144   :  { %v100_v32 = vmul.f32 %v3360_v29, %v70_v4 }
 0x146   :  { %v106_v37 = vmul.f32 %v3535_v30, %v100_v32 }
 0x148   :  { %v112_v41 = vadd.f32 %v3552_v36, %v106_v37 }
 0x14a   :  { %3048 = vmatmul.mubr.msk.f32.vlgmr.msra.gmra.mrb[0].mxu0 %vm60_vm0, %v112_v41  ;;  %3059 = vmatmul.mubr.msk.f32.vlgmr.msra.gmra.mrb[0].mxu1 %vm60_vm0, %v112_v41 }
 0x14b   :  { %3291 = vmatpush3.bf16.msra.mxu0 %v3555_v38  ;;  %3297 = vmatpush3.bf16.msra.mxu1 %v3557_v39 }
 0x14c   :  { %3292 = vmatprep.subr.bf16.mxu0 %v3429_v10  ;;  %3298 = vmatprep.subr.bf16.mxu1 %v3429_v10 }
 0x14d   :  { %3069 = vmatprep.mubr.msk.f32.mxu0 %vm3430_vm1, %v3431_v18  ;;  %3080 = vmatprep.mubr.msk.f32.mxu1 %vm3430_vm1, %v3431_v18 }
 0x14f   :  { %3294 = vmatpush3.bf16.msra.mxu0 %v3576_v45  ;;  %3300 = vmatpush3.bf16.msra.mxu1 %v3578_v46 }
 0x150   :  { %3083 = vmatprep.subr.mxu0 %v3431_v18  ;;  %3098 = vmatprep.subr.mxu1 %v3431_v18 }
 0x152   :  { %3070 = vmatmul.mubr.msk.f32.vlgmr.msra.gmra.mrb[2].mxu0 %vm60_vm0, %v112_v41  ;;  %3081 = vmatmul.mubr.msk.f32.vlgmr.msra.gmra.mrb[2].mxu1 %vm60_vm0, %v112_v41 }
 0x153   :  { %3085 = vmatprep.mubr.msk.f32.mxu0 %vm3430_vm1, %v3431_v18  ;;  %3100 = vmatprep.mubr.msk.f32.mxu1 %vm3430_vm1, %v3431_v18 }
 0x21d   :  { %v207_v48 = vpop.f32.mrb[0].mxu0  ;;  %v277_v49 = vpop.f32.mrb[0].mxu1 }
 0x21e   :  { %v208_v50 = vadd.f32 %v3599_v47, %v207_v48  ;;  %v3049_v51 = vpop.f32.mrb[1].mxu0  ;;  %v3060_v52 = vpop.f32.mrb[1].mxu1  ;;  %v278_v54 = vadd.f32 %v3605_v53, %v277_v49 }
 0x21f   :  { %v3671_v51 = vld [vmem:[%s3939_s0 + $0x8] sm:$0xff] }
 0x220   :  { %422 = vrot.lane.b32.xlu1 %v208_v50, %s3432_s19  ;;  %v64_v52 = vsel %vm60_vm0, %v3671_v51, 0.0 }
 0x224   :  { %500 = vrot.lane.b32.xlu1 %v278_v54, %s3432_s19 }
 0x225   :  { %v417_v57 = vpop.f32.mrb[2].mxu1  ;;  %v347_v58 = vpop.f32.mrb[2].mxu0 }
 0x226   :  { %v3621_v59 = vadd.f32 %v3612_v55, %v417_v57  ;;  %v3624_v60 = vadd.f32 %v3617_v56, %v347_v58  ;;  %v3071_v61 = vpop.f32.mrb[3].mxu0  ;;  %v3082_v62 = vpop.f32.mrb[3].mxu1 }
 0x228   :  { %577 = vrot.lane.b32.xlu0 %v3624_v60, %s3432_s19  ;;  %654 = vrot.lane.b32.xlu1 %v3621_v59, %s3432_s19 }
 0x292   :  { %v423_v63 = vpop.permute.xlu1 %422 }
 0x293   :  { %3084 = vmatpush3.xpose.msk.msra.mxu0 %vm424_vm4, %v423_v63 }
 0x294   :  { %3088 = vmatprep.subr.mxu0 %v3431_v18 }
 0x296   :  { %3086 = vmatmul.mubr.msk.f32.vlgmr.msra.gmra.mrb[4].mxu0 %vm424_vm4, %v208_v50  ;;  %v501_v1 = vpop.permute.xlu1 %500 }
 0x297   :  { %3089 = vmatpush3.xpose.msk.msra.mxu0 %vm424_vm4, %v501_v1  ;;  %3090 = vmatprep.mubr.msk.f32.mxu0 %vm3430_vm1, %v3431_v18 }
 0x298   :  { %3093 = vmatprep.subr.mxu0 %v3431_v18 }
 0x29a   :  { %v578_v2 = vpop.permute.xlu0 %577  ;;  %3091 = vmatmul.mubr.msk.f32.vlgmr.msra.gmra.mrb[6].mxu0 %vm424_vm4, %v278_v54  ;;  %v655_v3 = vpop.permute.xlu1 %654 }
 0x29b   :  { %3094 = vmatpush3.xpose.msk.msra.mxu0 %vm424_vm4, %v578_v2  ;;  %3099 = vmatpush3.xpose.msk.msra.mxu1 %vm424_vm4, %v655_v3 }
 0x29c   :  { %3095 = vmatprep.mubr.msk.f32.mxu0 %vm3430_vm1, %v3431_v18  ;;  %3103 = vmatprep.subr.mxu0 %v3431_v18 }
 0x29d   :  { %3108 = vmatprep.subr.mxu1 %v3431_v18 }
 0x29e   :  { %3096 = vmatmul.mubr.msk.f32.vlgmr.msra.gmra.mrb[8].mxu0 %vm424_vm4, %v3624_v60  ;;  %3101 = vmatmul.mubr.msk.f32.vlgmr.msra.gmra.mrb[4].mxu1 %vm424_vm4, %v3621_v59 }
 0x29f   :  { %3105 = vmatprep.mubr.msk.f32.mxu0 %vm3430_vm1, %v3431_v18  ;;  %3110 = vmatprep.mubr.msk.f32.mxu1 %vm3430_vm1, %v3431_v18 }
 0x369   :  { %v495_v4 = vpop.f32.mrb[4].mxu0 }
 0x36a   :  { %v3087_v5 = vpop.f32.mrb[5].mxu0  ;;  %v730_v6 = vsel %vm424_vm4, %v495_v4, -inf }
 0x36b   :  { %731 = vmax.xlane.f32.xlu1 %v730_v6 }
 0x36d   :  { %v572_v7 = vpop.f32.mrb[6].mxu0 }
 0x36e   :  { %v3092_v8 = vpop.f32.mrb[7].mxu0  ;;  %v733_v9 = vsel %vm424_vm4, %v572_v7, -inf }
 0x36f   :  { %734 = vmax.xlane.f32.xlu0 %v733_v9 }
 0x371   :  { %v649_v12 = vpop.f32.mrb[8].mxu0  ;;  %v726_v13 = vpop.f32.mrb[4].mxu1 }
 0x372   :  { %v3097_v14 = vpop.f32.mrb[9].mxu0  ;;  %v3102_v16 = vpop.f32.mrb[5].mxu1  ;;  %v736_v17 = vsel %vm424_vm4, %v649_v12, -inf  ;;  %v739_v21 = vsel %vm424_vm4, %v726_v13, -inf }
 0x373   :  { %737 = vmax.xlane.f32.xlu1 %v736_v17  ;;  %v3694_v14 = vld [vmem:[%s3943_s4] sm:$0xff]  ;;  %v3701_v16 = vld [vmem:[%s3943_s4 + $0x8] sm:$0xff] }
 0x377   :  { %740 = vmax.xlane.f32.xlu1 %v739_v21 }
 0x385   :  { %774 = vrot.lane.b32.xlu0 %v208_v50, %s3433_s3 }
 0x388   :  { %850 = vrot.lane.b32.xlu1 %v278_v54, %s3433_s3 }
 0x3f8   :  { %v732_v22 = vpop.xlane.xlu1 %731 }
 0x3f9   :  { %v742_v23 = vsub.f32 %v495_v4, %v732_v22  ;;  %v3708_v22 = vld [vmem:[%s3943_s4 + $0x10] sm:$0xff] }
 0x3fb   :  { %v746_v24 = vmul.f32 1.442695, %v742_v23 }
 0x3fc   :  { %v735_v25 = vpop.xlane.xlu0 %734 }
 0x3fd   :  { %3361 = vpow2.f32 %v746_v24  ;;  %v743_v26 = vsub.f32 %v572_v7, %v735_v25 }
 0x3ff   :  { %v748_v27 = vmul.f32 1.442695, %v743_v26 }
 0x400   :  { %v775_v28 = vpop.permute.xlu0 %774  ;;  %v738_v29 = vpop.xlane.xlu1 %737 }
 0x401   :  { %3363 = vpow2.f32 %v748_v27  ;;  %v744_v31 = vsub.f32 %v649_v12, %v738_v29  ;;  %3104 = vmatpush3.msra.mxu0 %v775_v28  ;;  %v3717_v27 = vld [vmem:[%s3943_s4 + $0x18] sm:$0xff] }
 0x402   :  { %3113 = vmatprep.subr.mxu0 %v3431_v18 }
 0x403   :  { %v750_v32 = vmul.f32 1.442695, %v744_v31 }
 0x404   :  { %v741_v33 = vpop.xlane.xlu1 %740 }
 0x405   :  { %3365 = vpow2.f32 %v750_v32  ;;  %v745_v34 = vsub.f32 %v726_v13, %v741_v33 }
 0x407   :  { %v3362_v35 = vpop.eup %3361  ;;  %v752_v37 = vmul.f32 1.442695, %v745_v34 }
 0x408   :  { %v851_v40 = vpop.permute.xlu1 %850  ;;  %v754_v41 = vsel %vm424_vm4, %v3362_v35, 0.0 }
 0x409   :  { %3367 = vpow2.f32 %v752_v37  ;;  %755 = vadd.xlane.f32.xlu1 %v754_v41  ;;  %3109 = vmatpush3.msra.mxu1 %v851_v40 }
 0x40a   :  { %3118 = vmatprep.subr.mxu1 %v3431_v18 }
 0x40b   :  { %v3364_v42 = vpop.eup %3363 }
 0x40c   :  { %v757_v43 = vsel %vm424_vm4, %v3364_v42, 0.0 }
 0x40d   :  { %758 = vadd.xlane.f32.xlu1 %v757_v43 }
 0x40f   :  { %v3366_v44 = vpop.eup %3365 }
 0x410   :  { %v760_v48 = vsel %vm424_vm4, %v3366_v44, 0.0 }
 0x411   :  { %761 = vadd.xlane.f32.xlu0 %v760_v48 }
 0x413   :  { %v3368_v49 = vpop.eup %3367 }
 0x414   :  { %v763_v50 = vsel %vm424_vm4, %v3368_v49, 0.0 }
 0x415   :  { %764 = vadd.xlane.f32.xlu1 %v763_v50 }
 0x426   :  { %926 = vrot.lane.b32.xlu1 %v3624_v60, %s3433_s3 }
 0x427   :  { %1002 = vrot.lane.b32.xlu0 %v3621_v59, %s3433_s3 }
 0x44a   :  { %65 = vadd.xlane.f32.xlu1 %v64_v52 }
 0x496   :  { %v756_v54 = vpop.xlane.xlu1 %755 }
 0x497   :  { %3369 = vrcp.f32 %v756_v54 }
 0x49a   :  { %v759_v57 = vpop.xlane.xlu1 %758 }
 0x49b   :  { %3371 = vrcp.f32 %v759_v57 }
 0x49e   :  { %v762_v58 = vpop.xlane.xlu0 %761 }
 0x49f   :  { %3373 = vrcp.f32 %v762_v58 }
 0x4a1   :  { %v3370_v61 = vpop.eup %3369 }
 0x4a2   :  { %v770_v60 = vmul.f32 %v3370_v61, %v3362_v35  ;;  %v765_v62 = vpop.xlane.xlu1 %764  ;;  %v1003_v2 = vpop.permute.xlu0 %1002 }
 0x4a3   :  { %3375 = vrcp.f32 %v765_v62 }
 0x4a4   :  { %3106 = vmatmul.mubr.msk.f32.vlgmr.msra.gmra.mrb[10].mxu0 %vm424_vm4, %v770_v60 }
 0x4a5   :  { %v3372_v59 = vpop.eup %3371  ;;  %3115 = vmatprep.mubr.msk.f32.mxu0 %vm3430_vm1, %v3431_v18 }
 0x4a6   :  { %v771_v63 = vmul.f32 %v3372_v59, %v3364_v42  ;;  %v927_v1 = vpop.permute.xlu1 %926 }
 0x4a7   :  { %3114 = vmatpush3.msra.mxu0 %v927_v1 }
 0x4a8   :  { %3111 = vmatmul.mubr.msk.f32.vlgmr.msra.gmra.mrb[6].mxu1 %vm424_vm4, %v771_v63  ;;  %3123 = vmatprep.subr.mxu0 %v3431_v18 }
 0x4a9   :  { %v3374_v3 = vpop.eup %3373  ;;  %3119 = vmatpush3.msra.mxu1 %v1003_v2  ;;  %3120 = vmatprep.mubr.msk.f32.mxu1 %vm3430_vm1, %v3431_v18 }
 0x4aa   :  { %v772_v4 = vmul.f32 %v3374_v3, %v3366_v44  ;;  %3128 = vmatprep.subr.mxu1 %v3431_v18 }
 0x4ac   :  { %3116 = vmatmul.mubr.msk.f32.vlgmr.msra.gmra.mrb[12].mxu0 %vm424_vm4, %v772_v4 }
 0x4ad   :  { %v3376_v5 = vpop.eup %3375  ;;  %3125 = vmatprep.mubr.msk.f32.mxu0 %vm3430_vm1, %v3431_v18  ;;  %3124 = vmatpush3.msra.mxu0 %v3694_v14 }
 0x4ae   :  { %v773_v6 = vmul.f32 %v3376_v5, %v3368_v49  ;;  %3133 = vmatprep.subr.mxu0 %v3431_v18 }
 0x4b0   :  { %3121 = vmatmul.mubr.msk.f32.vlgmr.msra.gmra.mrb[8].mxu1 %vm424_vm4, %v773_v6 }
 0x4b1   :  { %3130 = vmatprep.mubr.msk.f32.mxu1 %vm3430_vm1, %v3431_v18  ;;  %3129 = vmatpush3.msra.mxu1 %v3701_v16 }
 0x4b2   :  { %3138 = vmatprep.subr.mxu1 %v3431_v18 }
 0x4d7   :  { %v66_v7 = vpop.xlane.xlu1 %65 }
 0x4d8   :  { %v69_v8 = vmul.f32 0.03125, %v66_v7 }
 0x4da   :  { %v71_v9 = vsub.f32 %v3671_v51, %v69_v8 }
 0x4dc   :  { %v73_v12 = vmul.f32 %v71_v9, %v71_v9 }
 0x4de   :  { %v77_v13 = vsel %vm60_vm0, %v73_v12, 0.0 }
 0x4df   :  { %78 = vadd.xlane.f32.xlu0 %v77_v13 }
 0x56c   :  { %v79_v17 = vpop.xlane.xlu0 %78 }
 0x56d   :  { %v81_v21 = vmul.f32 0.032258064, %v79_v17 }
 0x56f   :  { %3377 = vrsqrt.f32 %v81_v21  ;;  %vm91_vm5 = vcmp.eq.f32.partialorder %v81_v21, inf  ;;  %v94_v28 = vand.u32 2147483648, %v81_v21  ;;  %vm93_vm6 = vcmp.eq.f32.partialorder %v81_v21, 0.0 }
 0x577   :  { %v846_v23 = vpop.f32.mrb[10].mxu0 }
 0x578   :  { %v3107_v24 = vpop.f32.mrb[11].mxu0  ;;  %3126 = vmatmul.mubr.msk.f32.vlgmr.msra.gmra.mrb[14].mxu0 %vm424_vm4, %v846_v23 }
 0x579   :  { %v3378_v25 = vpop.eup %3377  ;;  %3134 = vmatpush3.msra.mxu0 %v3708_v22  ;;  %3135 = vmatprep.mubr.msk.f32.mxu0 %vm3430_vm1, %v3431_v18 }
 0x57a   :  { %v90_v26 = vmul.f32 %v3378_v25, %v81_v21  ;;  %3301 = vmatprep.subr.bf16.mxu0 %v3429_v10 }
 0x57b   :  { %v922_v29 = vpop.f32.mrb[6].mxu1 }
 0x57c   :  { %v92_v31 = vsel %vm91_vm5, %v81_v21, %v90_v26  ;;  %v3112_v32 = vpop.f32.mrb[7].mxu1  ;;  %3131 = vmatmul.mubr.msk.f32.vlgmr.msra.gmra.mrb[10].mxu1 %vm424_vm4, %v922_v29 }
 0x57d   :  { %v95_v33 = vsel %vm93_vm6, %v94_v28, %v92_v31  ;;  %3139 = vmatpush3.msra.mxu1 %v3717_v27  ;;  %3140 = vmatprep.mubr.msk.f32.mxu1 %vm3430_vm1, %v3431_v18 }
 0x57e   :  { %v97_v34 = vadd.f32 1e-06, %v95_v33  ;;  %3307 = vmatprep.subr.bf16.mxu1 %v3429_v10 }
 0x57f   :  { %v998_v35 = vpop.f32.mrb[12].mxu0 }
 0x580   :  { %3379 = vrcp.f32 %v97_v34  ;;  %v3117_v37 = vpop.f32.mrb[13].mxu0  ;;  %3136 = vmatmul.mubr.msk.f32.vlgmr.msra.gmra.mrb[16].mxu0 %vm424_vm4, %v998_v35 }
 0x581   :  { %3303 = vmatpush3.bf16.msra.mxu0 %v3497_v11  ;;  %3151 = vmatprep.mubr.msk.f32.mxu0 %vm3430_vm1, %v3431_v18 }
 0x582   :  { %3304 = vmatprep.subr.bf16.mxu0 %v3429_v10 }
 0x583   :  { %v1074_v40 = vpop.f32.mrb[8].mxu1 }
 0x584   :  { %v3122_v41 = vpop.f32.mrb[9].mxu1  ;;  %3141 = vmatmul.mubr.msk.f32.vlgmr.msra.gmra.mrb[12].mxu1 %vm424_vm4, %v1074_v40 }
 0x585   :  { %3309 = vmatpush3.bf16.msra.mxu1 %v3508_v15  ;;  %3306 = vmatpush3.bf16.msra.mxu0 %v3521_v19 }
 0x586   :  { %3310 = vmatprep.subr.bf16.mxu1 %v3429_v10  ;;  %3162 = vmatprep.mubr.msk.f32.mxu1 %vm3430_vm1, %v3431_v18 }
 0x587   :  { %3313 = vmatprep.subr.bf16.mxu0 %v3429_v10 }
 0x589   :  { %3312 = vmatpush3.bf16.msra.mxu1 %v3525_v20 }
 0x58a   :  { %v3380_v11 = vpop.eup %3379  ;;  %3319 = vmatprep.subr.bf16.mxu1 %v3429_v10 }
 0x58b   :  { %v101_v42 = vmul.f32 %v3380_v11, %v71_v9 }
 0x58d   :  { %v107_v43 = vmul.f32 %v3535_v30, %v101_v42 }
 0x58f   :  { %v113_v44 = vadd.f32 %v3552_v36, %v107_v43 }
 0x591   :  { %3152 = vmatmul.mubr.msk.f32.vlgmr.msra.gmra.mrb[18].mxu0 %vm60_vm0, %v113_v44  ;;  %3163 = vmatmul.mubr.msk.f32.vlgmr.msra.gmra.mrb[14].mxu1 %vm60_vm0, %v113_v44 }
 0x592   :  { %3315 = vmatpush3.bf16.msra.mxu0 %v3555_v38  ;;  %3321 = vmatpush3.bf16.msra.mxu1 %v3557_v39 }
 0x593   :  { %3316 = vmatprep.subr.bf16.mxu0 %v3429_v10  ;;  %3322 = vmatprep.subr.bf16.mxu1 %v3429_v10 }
 0x594   :  { %3173 = vmatprep.mubr.msk.f32.mxu0 %vm3430_vm1, %v3431_v18  ;;  %3184 = vmatprep.mubr.msk.f32.mxu1 %vm3430_vm1, %v3431_v18 }
 0x596   :  { %3318 = vmatpush3.bf16.msra.mxu0 %v3576_v45  ;;  %3324 = vmatpush3.bf16.msra.mxu1 %v3578_v46 }
 0x597   :  { %3192 = vmatprep.subr.mxu1 %v3431_v18  ;;  %3187 = vmatprep.subr.mxu0 %v3431_v18 }
 0x599   :  { %3174 = vmatmul.mubr.msk.f32.vlgmr.msra.gmra.mrb[20].mxu0 %vm60_vm0, %v113_v44  ;;  %3185 = vmatmul.mubr.msk.f32.vlgmr.msra.gmra.mrb[16].mxu1 %vm60_vm0, %v113_v44 }
 0x59a   :  { %3189 = vmatprep.mubr.msk.f32.mxu0 %vm3430_vm1, %v3431_v18  ;;  %3194 = vmatprep.mubr.msk.f32.mxu1 %vm3430_vm1, %v3431_v18 }
 0x64b   :  { %v1147_v10 = vpop.f32.mrb[14].mxu0 }
 0x64c   :  { %v3127_v15 = vpop.f32.mrb[15].mxu0  ;;  %v1370_v20 = vsel %vm60_vm0, %v1147_v10, 0.0 }
 0x64f   :  { %v1220_v19 = vpop.f32.mrb[10].mxu1 }
 0x650   :  { %v1371_v30 = vsel %vm60_vm0, %v1220_v19, 0.0  ;;  %v3132_v36 = vpop.f32.mrb[11].mxu1 }
 0x651   :  { %v1372_v38 = vadd.f32 %v1371_v30, %v1370_v20 }
 0x653   :  { %v1293_v39 = vpop.f32.mrb[16].mxu0 }
 0x654   :  { %v1373_v45 = vsel %vm60_vm0, %v1293_v39, 0.0  ;;  %v3137_v46 = vpop.f32.mrb[17].mxu0 }
 0x655   :  { %v1374_v48 = vadd.f32 %v1373_v45, %v1372_v38  ;;  %v3822_v45 = vld [vmem:[%s3940_s1 + $0x4] ss:$0 sm:$0xff] }
 0x657   :  { %v1366_v49 = vpop.f32.mrb[12].mxu1 }
 0x658   :  { %v1375_v50 = vsel %vm60_vm0, %v1366_v49, 0.0  ;;  %v3142_v52 = vpop.f32.mrb[13].mxu1 }
 0x659   :  { %v3765_v54 = vadd.f32 %v1375_v50, %v1374_v48 }
 0x65b   :  { %v2619_v46 = vadd.f32 %v3822_v45, %v3765_v54 }
 0x65d   :  { %v3827_v48 = vadd.f32 %v2619_v46, %v3480_v0  ;;  %v2928_v46 = vld [vmem:[%s3940_s1 + $0x3] ss:$0 sm:$0xff] }
 0x65f   :  { %v2623_v49 = vsel %vm60_vm0, %v3827_v48, 0.0 }
 0x664   :  { %v1446_v57 = vpop.f32.mrb[18].mxu0  ;;  %v1516_v58 = vpop.f32.mrb[14].mxu1 }
 0x665   :  { %v1447_v61 = vadd.f32 %v3599_v47, %v1446_v57  ;;  %v1517_v60 = vadd.f32 %v3605_v53, %v1516_v58  ;;  %v3153_v62 = vpop.f32.mrb[19].mxu0  ;;  %v3164_v59 = vpop.f32.mrb[15].mxu1 }
 0x667   :  { %1738 = vrot.lane.b32.xlu1 %v1517_v60, %s3432_s19  ;;  %1661 = vrot.lane.b32.xlu0 %v1447_v61, %s3432_s19 }
 0x66c   :  { %v1586_v63 = vpop.f32.mrb[20].mxu0  ;;  %v1656_v1 = vpop.f32.mrb[16].mxu1 }
 0x66d   :  { %v3772_v2 = vadd.f32 %v3617_v56, %v1586_v63  ;;  %v3775_v3 = vadd.f32 %v3612_v55, %v1656_v1  ;;  %v3175_v4 = vpop.f32.mrb[21].mxu0  ;;  %v3186_v5 = vpop.f32.mrb[17].mxu1 }
 0x66f   :  { %1892 = vrot.lane.b32.xlu0 %v3775_v3, %s3432_s19  ;;  %1815 = vrot.lane.b32.xlu1 %v3772_v2, %s3432_s19 }
 0x6d9   :  { %v1739_v47 = vpop.permute.xlu1 %1738  ;;  %v1662_v53 = vpop.permute.xlu0 %1661 }
 0x6da   :  { %3188 = vmatpush3.xpose.msk.msra.mxu0 %vm424_vm4, %v1662_v53  ;;  %3193 = vmatpush3.xpose.msk.msra.mxu1 %vm424_vm4, %v1739_v47 }
 0x6db   :  { %3197 = vmatprep.subr.mxu0 %v3431_v18  ;;  %3202 = vmatprep.subr.mxu1 %v3431_v18 }
 0x6dd   :  { %3190 = vmatmul.mubr.msk.f32.vlgmr.msra.gmra.mrb[22].mxu0 %vm424_vm4, %v1447_v61  ;;  %3195 = vmatmul.mubr.msk.f32.vlgmr.msra.gmra.mrb[18].mxu1 %vm424_vm4, %v1517_v60 }
 0x6de   :  { %3199 = vmatprep.mubr.msk.f32.mxu0 %vm3430_vm1, %v3431_v18  ;;  %3204 = vmatprep.mubr.msk.f32.mxu1 %vm3430_vm1, %v3431_v18 }
 0x6e1   :  { %v1893_v55 = vpop.permute.xlu0 %1892  ;;  %v1816_v56 = vpop.permute.xlu1 %1815 }
 0x6e2   :  { %3198 = vmatpush3.xpose.msk.msra.mxu0 %vm424_vm4, %v1816_v56  ;;  %3203 = vmatpush3.xpose.msk.msra.mxu1 %vm424_vm4, %v1893_v55 }
 0x6e3   :  { %3207 = vmatprep.subr.mxu0 %v3431_v18  ;;  %3212 = vmatprep.subr.mxu1 %v3431_v18 }
 0x6e5   :  { %3200 = vmatmul.mubr.msk.f32.vlgmr.msra.gmra.mrb[24].mxu0 %vm424_vm4, %v3772_v2  ;;  %3205 = vmatmul.mubr.msk.f32.vlgmr.msra.gmra.mrb[20].mxu1 %vm424_vm4, %v3775_v3 }
 0x6e6   :  { %3209 = vmatprep.mubr.msk.f32.mxu0 %vm3430_vm1, %v3431_v18  ;;  %3214 = vmatprep.mubr.msk.f32.mxu1 %vm3430_vm1, %v3431_v18 }
 0x7b0   :  { %v1733_v6 = vpop.f32.mrb[22].mxu0  ;;  %v1810_v7 = vpop.f32.mrb[18].mxu1 }
 0x7b1   :  { %v3191_v8 = vpop.f32.mrb[23].mxu0  ;;  %v3196_v9 = vpop.f32.mrb[19].mxu1  ;;  %v1971_v12 = vsel %vm424_vm4, %v1810_v7, -inf  ;;  %v1968_v13 = vsel %vm424_vm4, %v1733_v6, -inf }
 0x7b2   :  { %1972 = vmax.xlane.f32.xlu0 %v1971_v12  ;;  %1969 = vmax.xlane.f32.xlu1 %v1968_v13 }
 0x7b8   :  { %v1887_v17 = vpop.f32.mrb[24].mxu0  ;;  %v1964_v21 = vpop.f32.mrb[20].mxu1 }
 0x7b9   :  { %v3201_v23 = vpop.f32.mrb[25].mxu0  ;;  %v3206_v24 = vpop.f32.mrb[21].mxu1  ;;  %v1977_v25 = vsel %vm424_vm4, %v1964_v21, -inf  ;;  %v1974_v26 = vsel %vm424_vm4, %v1887_v17, -inf }
 0x7ba   :  { %1978 = vmax.xlane.f32.xlu1 %v1977_v25  ;;  %1975 = vmax.xlane.f32.xlu0 %v1974_v26 }
 0x7cb   :  { %2088 = vrot.lane.b32.xlu1 %v1517_v60, %s3433_s3 }
 0x7d0   :  { %2012 = vrot.lane.b32.xlu0 %v1447_v61, %s3433_s3 }
 0x83f   :  { %v1973_v28 = vpop.xlane.xlu0 %1972  ;;  %v1970_v29 = vpop.xlane.xlu1 %1969 }
 0x840   :  { %v1981_v31 = vsub.f32 %v1810_v7, %v1973_v28  ;;  %v1980_v32 = vsub.f32 %v1733_v6, %v1970_v29 }
 0x842   :  { %v1986_v33 = vmul.f32 1.442695, %v1981_v31  ;;  %v1984_v34 = vmul.f32 1.442695, %v1980_v32 }
 0x844   :  { %3381 = vpow2.f32 %v1986_v33 }
 0x845   :  { %3383 = vpow2.f32 %v1984_v34 }
 0x847   :  { %v1979_v35 = vpop.xlane.xlu1 %1978  ;;  %v1976_v37 = vpop.xlane.xlu0 %1975 }
 0x848   :  { %v1983_v40 = vsub.f32 %v1964_v21, %v1979_v35  ;;  %v1982_v41 = vsub.f32 %v1887_v17, %v1976_v37 }
 0x84a   :  { %v1990_v11 = vmul.f32 1.442695, %v1983_v40  ;;  %v1988_v42 = vmul.f32 1.442695, %v1982_v41 }
 0x84b   :  { %v2089_v43 = vpop.permute.xlu1 %2088  ;;  %v2013_v44 = vpop.permute.xlu0 %2012 }
 0x84c   :  { %3385 = vpow2.f32 %v1990_v11  ;;  %3208 = vmatpush3.msra.mxu0 %v2013_v44  ;;  %3213 = vmatpush3.msra.mxu1 %v2089_v43 }
 0x84d   :  { %3387 = vpow2.f32 %v1988_v42  ;;  %3217 = vmatprep.subr.mxu0 %v3431_v18  ;;  %3222 = vmatprep.subr.mxu1 %v3431_v18 }
 0x84e   :  { %v3382_v10 = vpop.eup %3381 }
 0x84f   :  { %v3384_v15 = vpop.eup %3383  ;;  %v1995_v19 = vsel %vm424_vm4, %v3382_v10, 0.0 }
 0x850   :  { %1996 = vadd.xlane.f32.xlu1 %v1995_v19  ;;  %v1992_v20 = vsel %vm424_vm4, %v3384_v15, 0.0 }
 0x851   :  { %1993 = vadd.xlane.f32.xlu0 %v1992_v20 }
 0x856   :  { %v3386_v30 = vpop.eup %3385 }
 0x857   :  { %v3388_v36 = vpop.eup %3387  ;;  %v2001_v38 = vsel %vm424_vm4, %v3386_v30, 0.0 }
 0x858   :  { %2002 = vadd.xlane.f32.xlu1 %v2001_v38  ;;  %v1998_v39 = vsel %vm424_vm4, %v3388_v36, 0.0 }
 0x859   :  { %1999 = vadd.xlane.f32.xlu0 %v1998_v39  ;;  %v2927_v39 = vld [vmem:[%s3940_s1 + $0x2] ss:$0 sm:$0xff] }
 0x869   :  { %2164 = vrot.lane.b32.xlu1 %v3772_v2, %s3433_s3 }
 0x86f   :  { %2240 = vrot.lane.b32.xlu0 %v3775_v3, %s3433_s3 }
 0x88d   :  { %2624 = vadd.xlane.f32.xlu1 %v2623_v49 }
 0x8dd   :  { %v1997_v50 = vpop.xlane.xlu1 %1996 }
 0x8de   :  { %3389 = vrcp.f32 %v1997_v50  ;;  %v1994_v52 = vpop.xlane.xlu0 %1993 }
 0x8df   :  { %3391 = vrcp.f32 %v1994_v52  ;;  %v2675_v52 = vld [vmem:[%s3944_s5] sm:$0xff] }
 0x8e5   :  { %v2003_v57 = vpop.xlane.xlu1 %2002 }
 0x8e6   :  { %3393 = vrcp.f32 %v2003_v57  ;;  %v2000_v58 = vpop.xlane.xlu0 %1999  ;;  %v2676_v57 = vld [vmem:[%s3944_s5 + $0x8] sm:$0xff] }
 0x8e7   :  { %3395 = vrcp.f32 %v2000_v58  ;;  %v2677_v58 = vld [vmem:[%s3944_s5 + $0x10] sm:$0xff] }
 0x8e8   :  { %v3390_v61 = vpop.eup %3389 }
 0x8e9   :  { %v3392_v60 = vpop.eup %3391  ;;  %v2009_v62 = vmul.f32 %v3390_v61, %v3382_v10  ;;  %v2165_v0 = vpop.permute.xlu1 %2164  ;;  %v3325_v61 = vpack.c.bf16 %v2676_v57, %v2675_v52 }
 0x8ea   :  { %v2008_v59 = vmul.f32 %v3392_v60, %v3384_v15  ;;  %v2241_v54 = vpop.permute.xlu0 %2240  ;;  %v2678_v60 = vld [vmem:[%s3944_s5 + $0x18] sm:$0xff] }
 0x8eb   :  { %3215 = vmatmul.mubr.msk.f32.vlgmr.msra.gmra.mrb[22].mxu1 %vm424_vm4, %v2009_v62  ;;  %v3329_v62 = vpack.c.bf16 %v2678_v60, %v2677_v58 }
 0x8ec   :  { %3210 = vmatmul.mubr.msk.f32.vlgmr.msra.gmra.mrb[26].mxu0 %vm424_vm4, %v2008_v59  ;;  %3223 = vmatpush3.msra.mxu1 %v2241_v54  ;;  %v2766_v59 = vld [vmem:[%s3945_s6] sm:$0xff]  ;;  %v2767_v54 = vld [vmem:[%s3945_s6 + $0x8] sm:$0xff] }
 0x8ed   :  { %3218 = vmatpush3.msra.mxu0 %v2165_v0  ;;  %3219 = vmatprep.mubr.msk.f32.mxu0 %vm3430_vm1, %v3431_v18  ;;  %v2768_v0 = vld [vmem:[%s3945_s6 + $0x10] sm:$0xff] }
 0x8ee   :  { %3224 = vmatprep.mubr.msk.f32.mxu1 %vm3430_vm1, %v3431_v18  ;;  %3227 = vmatprep.subr.mxu0 %v3431_v18 }
 0x8ef   :  { %3232 = vmatprep.subr.mxu1 %v3431_v18 }
 0x8f0   :  { %v3394_v63 = vpop.eup %3393 }
 0x8f1   :  { %v3396_v1 = vpop.eup %3395  ;;  %v2011_v2 = vmul.f32 %v3394_v63, %v3386_v30  ;;  %v3333_v63 = vpack.c.bf16 %v2767_v54, %v2766_v59 }
 0x8f2   :  { %v2010_v3 = vmul.f32 %v3396_v1, %v3388_v36  ;;  %v2769_v1 = vld [vmem:[%s3945_s6 + $0x18] sm:$0xff] }
 0x8f3   :  { %3225 = vmatmul.mubr.msk.f32.vlgmr.msra.gmra.mrb[24].mxu1 %vm424_vm4, %v2011_v2  ;;  %v3337_v2 = vpack.c.bf16 %v2769_v1, %v2768_v0 }
 0x8f4   :  { %3220 = vmatmul.mubr.msk.f32.vlgmr.msra.gmra.mrb[28].mxu0 %vm424_vm4, %v2010_v3  ;;  %3233 = vmatpush3.msra.mxu1 %v3701_v16  ;;  %v2770_v3 = vld [vmem:[%s3945_s6 + $0x20] sm:$0xff] }
 0x8f5   :  { %3228 = vmatpush3.msra.mxu0 %v3694_v14  ;;  %3229 = vmatprep.mubr.msk.f32.mxu0 %vm3430_vm1, %v3431_v18 }
 0x8f6   :  { %3234 = vmatprep.mubr.msk.f32.mxu1 %vm3430_vm1, %v3431_v18  ;;  %3237 = vmatprep.subr.mxu0 %v3431_v18 }
 0x8f7   :  { %3242 = vmatprep.subr.mxu1 %v3431_v18 }
 0x91a   :  { %v2625_v13 = vpop.xlane.xlu1 %2624 }
 0x91b   :  { %v2629_v25 = vmul.f32 0.03125, %v2625_v13  ;;  %v2773_v13 = vld [vmem:[%s3945_s6 + $0x38] sm:$0xff] }
 0x91d   :  { %v2631_v31 = vsub.f32 %v3827_v48, %v2629_v25 }
 0x91f   :  { %v2633_v35 = vmul.f32 %v2631_v31, %v2631_v31 }
 0x921   :  { %v2635_v37 = vsel %vm60_vm0, %v2633_v35, 0.0 }
 0x9be   :  { %v2160_v4 = vpop.f32.mrb[22].mxu1 }
 0x9bf   :  { %v2084_v5 = vpop.f32.mrb[26].mxu0  ;;  %v3216_v47 = vpop.f32.mrb[23].mxu1  ;;  %3235 = vmatmul.mubr.msk.f32.vlgmr.msra.gmra.mrb[26].mxu1 %vm424_vm4, %v2160_v4  ;;  %v2771_v4 = vld [vmem:[%s3945_s6 + $0x28] sm:$0xff] }
 0x9c0   :  { %v3211_v53 = vpop.f32.mrb[27].mxu0  ;;  %3230 = vmatmul.mubr.msk.f32.vlgmr.msra.gmra.mrb[30].mxu0 %vm424_vm4, %v2084_v5  ;;  %3243 = vmatpush3.msra.mxu1 %v3717_v27  ;;  %v3341_v5 = vpack.c.bf16 %v2771_v4, %v2770_v3 }
 0x9c1   :  { %3238 = vmatpush3.msra.mxu0 %v3708_v22  ;;  %3239 = vmatprep.mubr.msk.f32.mxu0 %vm3430_vm1, %v3431_v18 }
 0x9c2   :  { %3244 = vmatprep.mubr.msk.f32.mxu1 %vm3430_vm1, %v3431_v18  ;;  %3326 = vmatprep.subr.bf16.mxu0 %v3325_v61 }
 0x9c3   :  { %3334 = vmatprep.subr.bf16.mxu1 %v3333_v63 }
 0x9c6   :  { %v2312_v14 = vpop.f32.mrb[24].mxu1 }
 0x9c7   :  { %v2236_v16 = vpop.f32.mrb[28].mxu0  ;;  %v3226_v55 = vpop.f32.mrb[25].mxu1  ;;  %3245 = vmatmul.mubr.msk.f32.vlgmr.msra.gmra.mrb[28].mxu1 %vm424_vm4, %v2312_v14 }
 0x9c8   :  { %v3221_v56 = vpop.f32.mrb[29].mxu0  ;;  %3240 = vmatmul.mubr.msk.f32.vlgmr.msra.gmra.mrb[32].mxu0 %vm424_vm4, %v2236_v16  ;;  %3336 = vmatpush3.bf16.msra.mxu1 %v3333_v63 }
 0x9c9   :  { %3328 = vmatpush3.bf16.msra.mxu0 %v3325_v61  ;;  %3338 = vmatprep.subr.bf16.mxu1 %v3337_v2 }
 0x9ca   :  { %3330 = vmatprep.subr.bf16.mxu0 %v3329_v62 }
 0x9cc   :  { %3340 = vmatpush3.bf16.msra.mxu1 %v3337_v2 }
 0x9cd   :  { %3332 = vmatpush3.bf16.msra.mxu0 %v3329_v62  ;;  %3342 = vmatprep.subr.bf16.mxu1 %v3341_v5 }
 0x9d0   :  { %3344 = vmatpush3.bf16.msra.mxu1 %v3341_v5 }
 0xa92   :  { %v2458_v6 = vpop.f32.mrb[26].mxu1 }
 0xa93   :  { %v2385_v7 = vpop.f32.mrb[30].mxu0  ;;  %v2609_v27 = vsel %vm60_vm0, %v2458_v6, 0.0  ;;  %v3236_v8 = vpop.f32.mrb[27].mxu1 }
 0xa94   :  { %v2608_v22 = vsel %vm60_vm0, %v2385_v7, 0.0  ;;  %v3231_v9 = vpop.f32.mrb[31].mxu0 }
 0xa95   :  { %v2610_v12 = vadd.f32 %v2609_v27, %v2608_v22 }
 0xa9a   :  { %v2604_v17 = vpop.f32.mrb[28].mxu1 }
 0xa9b   :  { %v2531_v18 = vpop.f32.mrb[32].mxu0  ;;  %v3246_v21 = vpop.f32.mrb[29].mxu1  ;;  %v2613_v28 = vsel %vm60_vm0, %v2604_v17, 0.0 }
 0xa9c   :  { %v2611_v23 = vsel %vm60_vm0, %v2531_v18, 0.0  ;;  %v3241_v24 = vpop.f32.mrb[33].mxu0  ;;  %v2929_v18 = vld [vmem:[%s3940_s1 + $0x6] ss:$0 sm:$0xff] }
 0xa9d   :  { %v2612_v26 = vadd.f32 %v2611_v23, %v2610_v12  ;;  %v2772_v12 = vld [vmem:[%s3945_s6 + $0x30] sm:$0xff]  ;;  %s3434_s6 = smov [#allocation2]  }
 0xa9e   :  { %v3345_v17 = vpack.c.bf16 %v2773_v13, %v2772_v12  ;;  %s2869_s15 = sshll.u32 %s3434_s6, 4  ;;  %s2870_s15 = int_to_ptr.vmem [resolvable:$true] %s2869_s15 }
 0xa9f   :  { %v2614_v29 = vadd.f32 %v2613_v28, %v2612_v26  ;;  %s3405_s2 = scalar_lea.vmem %s2870_s15, 256  ;;  %p3410_p1 = scmp.lt.s32.totalorder %s2870_s15, %s2870_s15 }
 0xaa0   :  { %3346 = vmatprep.subr.bf16.mxu1 %v3345_v17  ;;  %p3406_p0 = scmp.ne.s32.totalorder %s2870_s15, %s3405_s2  ;;  %p3411_p2 = scmp.lt.s32.totalorder %s3405_s2, %s3405_s2 }
 0xaa1   :  { %v2620_v32 = vadd.f32 %v3822_v45, %v2614_v29  ;;  %3348 = vmatpush3.bf16.msra.mxu1 %v3345_v17  ;;  %v2932_v29 = vld [vmem:[%s3940_s1 + $0x5] ss:$0 sm:$0xff] }
 0xaa2   :  { %p3412_p3 = por %p3411_p2, %p3410_p1 }
 0xaa3   :  { %v3866_v33 = vadd.f32 %v2620_v32, %v3671_v51 }
 0xaa4   :  { %p3413_p4 = pnand %p3412_p3, %p3406_p0 }
 0xaa5   :  { %v2626_v34 = vsel %vm60_vm0, %v3866_v33, 0.0 }
 0xaa6   :  { %2627 = vadd.xlane.f32.xlu0 %v2626_v34 }
 0xaaa   :  { %2636 = vadd.xlane.f32.xlu0 %v2635_v37 }
 0xb33   :  { %v2628_v40 = vpop.xlane.xlu0 %2627 }
 0xb34   :  { %v2630_v41 = vmul.f32 0.03125, %v2628_v40 }
 0xb36   :  { %v2632_v11 = vsub.f32 %v3866_v33, %v2630_v41 }
 0xb37   :  { %v2637_v42 = vpop.xlane.xlu0 %2636 }
 0xb38   :  { %v2641_v43 = vmul.f32 0.032258064, %v2637_v42  ;;  %v2634_v44 = vmul.f32 %v2632_v11, %v2632_v11 }
 0xb3a   :  { %3397 = vrsqrt.f32 %v2641_v43  ;;  %v2638_v10 = vsel %vm60_vm0, %v2634_v44, 0.0  ;;  %vm2645_vm7 = vcmp.eq.f32.partialorder %v2641_v43, inf  ;;  %v2648_v19 = vand.u32 2147483648, %v2641_v43 }
 0xb3b   :  { %2639 = vadd.xlane.f32.xlu1 %v2638_v10  ;;  %vm2647_vm8 = vcmp.eq.f32.partialorder %v2641_v43, 0.0 }
 0xb44   :  { %v3398_v51 = vpop.eup %3397 }
 0xb45   :  { %v2644_v15 = vmul.f32 %v3398_v51, %v2641_v43 }
 0xb47   :  { %v2646_v20 = vsel %vm2645_vm7, %v2641_v43, %v2644_v15 }
 0xb48   :  { %v2649_v30 = vsel %vm2647_vm8, %v2648_v19, %v2646_v20 }
 0xb49   :  { %v2657_v36 = vadd.f32 1e-06, %v2649_v30 }
 0xb4b   :  { %3399 = vrcp.f32 %v2657_v36 }
 0xb55   :  { %v3400_v38 = vpop.eup %3399 }
 0xb56   :  { %v2661_v45 = vmul.f32 %v3400_v38, %v2631_v31 }
 0xb58   :  { %v2667_v49 = vmul.f32 %v2927_v39, %v2661_v45 }
 0xb5a   :  { %v2673_v50 = vadd.f32 %v2928_v46, %v2667_v49 }
 0xb5c   :  { %3255 = vmatprep.mubr.msk.f32.mxu0 %vm60_vm0, %v2673_v50 }
 0xbc8   :  { %v2640_v47 = vpop.xlane.xlu1 %2639 }
 0xbc9   :  { %v2642_v53 = vmul.f32 0.032258064, %v2640_v47 }
 0xbcb   :  { %3401 = vrsqrt.f32 %v2642_v53  ;;  %vm2652_vm9 = vcmp.eq.f32.partialorder %v2642_v53, inf  ;;  %v2655_v55 = vand.u32 2147483648, %v2642_v53  ;;  %vm2654_vm10 = vcmp.eq.f32.partialorder %v2642_v53, 0.0 }
 0xbd5   :  { %v3402_v14 = vpop.eup %3401 }
 0xbd6   :  { %v2651_v16 = vmul.f32 %v3402_v14, %v2642_v53 }
 0xbd8   :  { %v2653_v56 = vsel %vm2652_vm9, %v2642_v53, %v2651_v16 }
 0xbd9   :  { %v2656_v6 = vsel %vm2654_vm10, %v2655_v55, %v2653_v56 }
 0xbda   :  { %v2658_v7 = vadd.f32 1e-06, %v2656_v6 }
 0xbdc   :  { %3403 = vrcp.f32 %v2658_v7 }
 0xbe6   :  { %v3404_v27 = vpop.eup %3403 }
 0xbe7   :  { %v2662_v8 = vmul.f32 %v3404_v27, %v2632_v11 }
 0xbe9   :  { %v2668_v22 = vmul.f32 %v2927_v39, %v2662_v8 }
 0xbeb   :  { %v2674_v9 = vadd.f32 %v2928_v46, %v2668_v22 }
 0xbed   :  { %3256 = vmatmul.mubr.msk.f32.vlgmr.msra.gmra.mrb[34].mxu0 %vm60_vm0, %v2674_v9 }
 0xcc0   :  { %v3257_v21 = vpop.f32.mrb[34].mxu0 }
 0xcc1   :  { %v2761_v23 = vadd.f32 %v3257_v21, %v2929_v18  ;;  %v2755_v24 = vpop.f32.mrb[35].mxu0 }
 0xcc2   :  { %v2756_v25 = vadd.f32 %v2929_v18, %v2755_v24 }
 0xcc3   :  { %v2765_v28 = vmax.f32 %v2761_v23, 0.0 }
 0xcc4   :  { %v2764_v26 = vmax.f32 %v2756_v25, 0.0 }
 0xcc6   :  { %3274 = vmatprep.mubr.msk.f32.mxu1 %vm2778_vm11, %v2764_v26 }
 0xcc7   :  { %3275 = vmatmul.mubr.msk.f32.vlgmr.msra.gmra.mrb[30].mxu1 %vm2778_vm11, %v2765_v28 }
 0xd9a   :  { %v3276_v31 = vpop.f32.mrb[30].mxu1 }
 0xd9b   :  { %v2857_v32 = vadd.f32 %v3276_v31, %v2932_v29  ;;  %v2851_v34 = vpop.f32.mrb[31].mxu1 }
 0xd9c   :  { %v2852_v35 = vadd.f32 %v2932_v29, %v2851_v34 }
 0xd9d   :  { %v2861_v37 = vadd.f32 %v2857_v32, %v3866_v33 }
 0xd9e   :  { %v2860_v40 = vadd.f32 %v2852_v35, %v3827_v48 }
 0xd9f   :  { %2863 = vst.msk [vmem:[#allocation2 + $0x8] sm:$0xff] %vm60_vm0, %v2861_v37 }
 0xda0   :  { %2862 = vst.msk [vmem:[#allocation2] sm:$0xff] %vm60_vm0, %v2860_v40 }
 0xda1   :  { %3416 = shalt.err (!%p3413_p4)
}
 0xda2   :  { %s3417_s17 = scalar_lea.hbm %s3946_s7, 256 }
 0xda3   :  { %p3418_p5 = scmp.ne.s32.totalorder %s3946_s7, %s3417_s17  ;;  %p3421_p6 = scmp.lt.u32.totalorder %s3417_s17, %s3946_s7 }
 0xda5   :  { %p3423_p7 = pnand %p3421_p6, %p3418_p5 }
 0xda7   :  { %3426 = shalt.err (!%p3423_p7)
}
 0xda8   :  { %s3435_s22 = smov 128   ;;  %s3436_s23 = smov 8  }
 0xda9   :  { %2875 = dma.vmem_to_hbm [thread:$0]  %s2870_s15, 256, %s3946_s7, [#allocation3], %s3435_s22, %s3435_s22, %s3436_s23  }
 0xdaa   :  { %3427 = dma.done.wait [#allocation3], 256  }
 0xdab   :  { %3428 = vsyncadd [#allocation3], 4294967040 }
 0xdac   :  { %2879 = vsyncpa [#allocation3], 1 }

</bundles_post_ra>
